<compile_context>
chip_gen: v7x
topology: tpu7x:2x2x1
jax: 0.10.0
libtpu: 0.0.40
codegen_flags: <defaults>
</compile_context>

<pallas_src>
import jax
import jax.numpy as jnp
from jax.experimental import pallas as pl
from jax.experimental.pallas import tpu as pltpu


def _layer_scale_kernel(x_ref, s_ref, o_ref):
    # x_ref: (r_tile, t_tile) in x.dtype
    # s_ref: (r_tile, 1)      in x.dtype (per-row scale, drop-path folded in)
    # o_ref: (r_tile, t_tile) in x.dtype
    o_ref[...] = x_ref[...] * s_ref[...]


def _round_up(x, m):
    return ((x + m - 1) // m) * m


def _vmem_cap_bytes():
    """Generation-aware scoped-VMEM budget (leave headroom under physical)."""
    try:
        phys = pltpu.get_tpu_info().vmem_capacity_bytes
    except Exception:
        phys = 64 * 1024 * 1024  # conservative: v7x has the smallest VMEM
    if phys >= 100 * 1024 * 1024:      # v5e / v6e: 128 MiB physical
        return 64 * 1024 * 1024
    return 40 * 1024 * 1024            # v7x: 64 MiB physical


def _select_tiles(rows, T, itemsize, cap_bytes):
    """Pick (r_tile, t_tile).

    r_tile is packed-sublane aligned for the dtype; t_tile is either the full
    T (preferred) or a 128-aligned split when a full-T block would blow the
    VMEM budget.  Grid raggedness is handled by pl.cdiv + Pallas masking.
    """
    sub = max(8, 32 // itemsize)             # 8 f32, 16 bf16, 32 int8/fp8
    lane = 128
    # in + out double-buffered -> 4 resident data blocks; keep slack for the
    # lane-padded scale blocks and compiler scratch.
    block_budget = max(sub * lane * itemsize,
                       (cap_bytes - 4 * 1024 * 1024) // 4)

    t_pad = _round_up(T, lane)
    rows_cap = _round_up(rows, sub)

    if sub * t_pad * itemsize <= block_budget:
        # Full-T blocks fit even at the minimum row tile: keep T whole and
        # grow the row tile into the budget (capped to bound scale-buffer
        # padding and keep per-block time moderate).
        t_tile = T
        r_fit = block_budget // (t_pad * itemsize)
        r_tile = min(1024, (r_fit // sub) * sub, rows_cap)
        r_tile = max(sub, r_tile)
    else:
        # Must split T: fixed row tile, largest 128-aligned T tile that fits.
        r_tile = max(sub, (min(512, rows_cap) // sub) * sub)
        t_fit = block_budget // (r_tile * itemsize)
        t_tile = max(lane, (t_fit // lane) * lane)
        t_tile = min(t_tile, t_pad)

    # Megacore: ensure >= 2 blocks along a "parallel" axis whenever there is
    # enough work, so both v7x TensorCores are used.
    if pl.cdiv(rows, r_tile) * pl.cdiv(T, t_tile) < 2:
        if rows > sub:
            r_tile = max(sub, _round_up(pl.cdiv(rows, 2), sub))
        elif T > lane:
            t_tile = max(lane, _round_up(pl.cdiv(T, 2), lane))
    return r_tile, t_tile


def layer_scale(x, scale, *, pdrop=0.0, training=False, key=None):
    """LayerScale forward. x: (B, C, T); scale: (1, C, 1) or (C,)."""
    B, C, T = x.shape
    scale_c = jnp.reshape(scale, (C,)).astype(jnp.float32)

    # drop_path per-sample factor: 0 or 1/keep_prob (1.0 in eval / pdrop == 0).
    if training and pdrop > 0.0:
        assert key is not None, "training-mode drop_path needs a PRNG key"
        keep_prob = 1.0 - pdrop
        u = jax.random.uniform(key, (B,), dtype=jnp.float32)
        drop = jnp.floor(keep_prob + u) / keep_prob
    else:
        drop = jnp.ones((B,), dtype=jnp.float32)

    # Fold scale and drop-path factor into one per-row vector (B*C elements,
    # negligible next to the (B, C, T) slab), cast to x.dtype so the kernel
    # multiply matches the reference `scale.to(x.dtype) * x` numerics.
    rows = B * C
    row_scale = (drop[:, None] * scale_c[None, :]).reshape(rows, 1).astype(x.dtype)
    x2 = x.reshape(rows, T)  # contiguous merge of leading dims: metadata-only

    itemsize = jnp.dtype(x.dtype).itemsize
    cap = _vmem_cap_bytes()
    r_tile, t_tile = _select_tiles(rows, T, itemsize, cap)

    # T innermost so the (r_tile, 1) scale block stays resident across it.
    grid = (pl.cdiv(rows, r_tile), pl.cdiv(T, t_tile))

    blk_bytes = r_tile * _round_up(t_tile, 128) * itemsize
    scale_blk_bytes = r_tile * 128 * itemsize  # lane-padded scale block
    vmem_limit = int(min(cap, max(16 * 1024 * 1024,
                                  4 * blk_bytes + 2 * scale_blk_bytes
                                  + 2 * 1024 * 1024)))

    out2 = pl.pallas_call(
        _layer_scale_kernel,
        out_shape=jax.ShapeDtypeStruct((rows, T), x.dtype),
        grid_spec=pltpu.PrefetchScalarGridSpec(
            num_scalar_prefetch=0,
            grid=grid,
            in_specs=[
                pl.BlockSpec((r_tile, t_tile), lambda i, t: (i, t)),
                pl.BlockSpec((r_tile, 1), lambda i, t: (i, 0)),
            ],
            out_specs=pl.BlockSpec((r_tile, t_tile), lambda i, t: (i, t)),
        ),
        compiler_params=pltpu.CompilerParams(
            dimension_semantics=("parallel", "parallel"),
            vmem_limit_bytes=vmem_limit,
        ),
    )(x2, row_scale)

    # TODO(synk): for real model use, fuse the downstream residual add
    # (x_res + LayerScale(y)) as a second kernel input — the standalone kernel
    # is already at the 1-read+1-write HBM roofline, so that fusion is the
    # remaining system-level win.
    return out2.reshape(B, C, T)


if __name__ == "__main__":
    key = jax.random.PRNGKey(0)
    kx, kx2, kd = jax.random.split(key, 3)

    # Small shapes implied by the module: x is (B, C, T) in NCW layout.
    B, C, T = 2, 4, 16
    x = jax.random.normal(kx, (B, C, T), dtype=jnp.float32)
    # Per-channel scale (zero-ish init in the paper; non-uniform so a
    # broadcasting bug would be caught).
    scale = 1e-4 * (1.0 + jnp.arange(C, dtype=jnp.float32)).reshape(1, C, 1)

    # 1) Eval-mode forward (drop_path is identity).
    out = jax.block_until_ready(layer_scale(x, scale))
    ref = scale.astype(x.dtype) * x
    assert out.shape == (B, C, T)
    assert jnp.allclose(out, ref, atol=1e-6, rtol=1e-6)

    # 2) Longer T exercises the cdiv grid / T-tiling and the >=2-blocks rule.
    T2 = 4096
    x_long = jax.random.normal(kx2, (B, C, T2), dtype=jnp.float32)
    out_long = jax.block_until_ready(layer_scale(x_long, scale))
    ref_long = scale.astype(x_long.dtype) * x_long
    assert jnp.allclose(out_long, ref_long, atol=1e-6, rtol=1e-6)

    # 3) Ragged T (not a multiple of 128) to exercise partial lane blocks.
    T3 = 200
    x_rag = jax.random.normal(kd, (B, C, T3), dtype=jnp.float32)
    out_rag = jax.block_until_ready(layer_scale(x_rag, scale))
    ref_rag = scale.astype(x_rag.dtype) * x_rag
    assert jnp.allclose(out_rag, ref_rag, atol=1e-6, rtol=1e-6)

    # 4) Training-mode drop_path: each sample is either dropped (all zeros) or
    #    kept and rescaled by 1/keep_prob.
    pdrop = 0.5
    out_tr = jax.block_until_ready(
        layer_scale(x, scale, pdrop=pdrop, training=True, key=kd))
    kept = scale.astype(x.dtype) * x / (1.0 - pdrop)
    for b in range(B):
        dropped_ok = bool(jnp.allclose(out_tr[b], jnp.zeros_like(out_tr[b])))
        kept_ok = bool(jnp.allclose(out_tr[b], kept[b], atol=1e-6, rtol=1e-6))
        assert dropped_ok or kept_ok

    print("KERNEL_OK")
</pallas_src>

<mosaic_0001>
module attributes {stable_mosaic.version = 11 : i64} {
  func.func @_layer_scale_kernel(%arg0: i32, %arg1: i32, %arg2: memref<8x16xf32, #tpu.memory_space<vmem>>, %arg3: memref<8x1xf32, #tpu.memory_space<vmem>>, %arg4: memref<8x16xf32, #tpu.memory_space<vmem>>) attributes {dimension_semantics = [#tpu.dimension_semantics<parallel>, #tpu.dimension_semantics<parallel>], iteration_bounds = array<i64: 1, 1>, scalar_prefetch = 0 : i64, scratch_operands = 0 : i64, tpu.core_type = #tpu.core_type<tc>, window_params = [{transform_indices = @transform_0, window_bounds = array<i64: 8, 16>}, {transform_indices = @transform_1, window_bounds = array<i64: 8, 1>}, {transform_indices = @transform_2, window_bounds = array<i64: 8, 16>}]} {
    %c0 = arith.constant 0 : index
    %c0_0 = arith.constant 0 : index
    %0 = vector.load %arg2[%c0, %c0_0] : memref<8x16xf32, #tpu.memory_space<vmem>>, vector<8x16xf32>
    %c0_1 = arith.constant 0 : index
    %c0_2 = arith.constant 0 : index
    %1 = vector.load %arg3[%c0_1, %c0_2] : memref<8x1xf32, #tpu.memory_space<vmem>>, vector<8x1xf32>
    %2 = vector.broadcast %1 : vector<8x1xf32> to vector<8x16xf32>
    %3 = arith.mulf %0, %2 : vector<8x16xf32>
    %c0_3 = arith.constant 0 : index
    %c0_4 = arith.constant 0 : index
    %4 = vector.load %arg4[%c0_3, %c0_4] : memref<8x16xf32, #tpu.memory_space<vmem>>, vector<8x16xf32>
    tpu.vector_store %arg4[%c0_3, %c0_4], %3 {strides = array<i32>} : memref<8x16xf32, #tpu.memory_space<vmem>>, vector<8x16xf32>,
    return
  }
  func.func @transform_0(%arg0: i32, %arg1: i32) -> (i32, i32) {
    %c0_i32 = arith.constant 0 : i32
    return %arg0, %arg1 : i32, i32
  }
  func.func @transform_1(%arg0: i32, %arg1: i32) -> (i32, i32) {
    %c0_i32 = arith.constant 0 : i32
    %c0_i32_0 = arith.constant 0 : i32
    return %arg0, %c0_i32 : i32, i32
  }
  func.func @transform_2(%arg0: i32, %arg1: i32) -> (i32, i32) {
    %c0_i32 = arith.constant 0 : i32
    return %arg0, %arg1 : i32, i32
  }
}

</mosaic_0001>

<bundles_post_ra>
// kernel: tpu_custom_call.1
= control target key start
LH: loop header
LB: loop body
LE: loop exit
PB: predicated region body
PF: predicated region fallthrough
CT: control target
= control target key end

     0   :  { %s98_s0 = inlined_call_operand.vmem [shape: f32[8,16], index: 0, kind: input, shape index: {}]   ;;  %s99_s1 = inlined_call_operand.vmem [shape: f32[8,1], index: 1, kind: input, shape index: {}]   ;;  %s100_s2 = inlined_call_operand.hbm [shape: f32[8,16], index: 2, kind: output, shape index: {}]  }
   0x1   :  { %v13_v0 = vld [vmem:[%s99_s1] sm:$0xff] }
   0x2   :  { %7 = vsyncpa [#allocation3], 0  ;;  %v63_v1 = vmov 0   ;;  %v12_v2 = vld [vmem:[%s98_s0] sm:$0xff]  ;;  %s64_s13 = smov [#allocation2]   ;;  %vm20_vm0 = vcmask 130048  }
   0x3   :  { %38 = vset.pattern.permute.xlu0 %v63_v1  ;;  %s28_s14 = sshll.u32 %s64_s13, 4  ;;  %s29_s14 = int_to_ptr.vmem [resolvable:$true] %s28_s14 }
   0x4   :  { %16 = vperm.xlu0 %38, %v13_v0   ;;  %s39_s15 = scalar_lea.vmem %s29_s14, 128  ;;  %p44_p1 = scmp.lt.s32.totalorder %s29_s14, %s29_s14 }
   0x5   :  { %p40_p0 = scmp.ne.s32.totalorder %s29_s14, %s39_s15  ;;  %p45_p2 = scmp.lt.s32.totalorder %s39_s15, %s39_s15 }
   0x7   :  { %p46_p3 = por %p45_p2, %p44_p1 }
   0x9   :  { %p47_p4 = pnand %p46_p3, %p40_p0 }
  0x83   :  { %v17_v3 = vpop.permute.xlu0 %16 }
  0x84   :  { %v19_v4 = vmul.f32 %v17_v3, %v12_v2 }
  0x86   :  { %21 = vst.msk [vmem:[#allocation2] sm:$0xff] %vm20_vm0, %v19_v4 }
  0x87   :  { %50 = shalt.err (!%p47_p4)
}
  0x88   :  { %s51_s17 = scalar_lea.hbm %s100_s2, 128 }
  0x89   :  { %p52_p5 = scmp.ne.s32.totalorder %s100_s2, %s51_s17  ;;  %p55_p6 = scmp.lt.u32.totalorder %s51_s17, %s100_s2 }
  0x8b   :  { %p57_p7 = pnand %p55_p6, %p52_p5 }
  0x8d   :  { %60 = shalt.err (!%p57_p7)
}
  0x8e   :  { %31 = dma.vmem_to_hbm [thread:$0]  %s29_s14, 128, %s100_s2, [#allocation3]  }
  0x8f   :  { %61 = dma.done.wait [#allocation3], 128  }
  0x90   :  { %62 = vsyncadd [#allocation3], 4294967168 }
  0x91   :  { %35 = vsyncpa [#allocation3], 1 }

</bundles_post_ra>
